<compile_context>
chip_gen: v7x
topology: tpu7x:2x2x1
jax: 0.10.0
libtpu: 0.0.40
codegen_flags: <defaults>
</compile_context>

<pallas_src>
import jax
import jax.numpy as jnp
from jax import lax
from jax.experimental import pallas as pl
from jax.experimental.pallas import tpu as pltpu


def _mlp_kernel(x_ref, w_ref, b_ref, o_ref):
    # x_ref: (C, t)  channels x token-tile (native NCHW layout, no transpose)
    # w_ref: (C, E)  weight pre-transposed to (in, out)
    # b_ref: (1, E)
    # o_ref: (t, E)
    acc = lax.dot_general(
        x_ref[...], w_ref[...],
        dimension_numbers=(((0,), (0,)), ((), ())),   # contract the channel axis
        preferred_element_type=jnp.float32,
    )                                                 # (t, E) f32 on the MXU
    o_ref[...] = (acc + b_ref[...].astype(jnp.float32)).astype(o_ref.dtype)


def _device_kind():
    try:
        return jax.devices()[0].device_kind.lower()
    except Exception:
        return ""


def _choose_token_tile(HW, B, C, E, x_bytes, out_bytes, w_bytes):
    """Per-generation token tile: big enough to amortize the ~0.35us/step
    overhead, small enough for the default scoped-VMEM limit, and giving
    enough grid steps to keep both v7x TensorCores + the pipeline busy."""
    kind = _device_kind()
    if "v5 lite" in kind or "v5e" in kind or "v5lite" in kind:
        t_pref, budget, min_steps = 512, 14 << 20, 2     # 16 MiB default scoped VMEM
    elif "v7" in kind:
        t_pref, budget, min_steps = 2048, 28 << 20, 4    # 2 TCs -> >=2 steps per core
    else:                                                # v6e and anything unknown
        t_pref, budget, min_steps = 1024, 28 << 20, 2

    def _valid(t):            # full extent, or a multiple of 128 (lane-dense loads)
        return HW if t >= HW else max(128, (t // 128) * 128)

    def _shrink(t):
        nt = _valid(t // 2)
        return nt if nt < t else t

    def _fits(t):             # double-buffered x/out tiles + resident weight/bias
        need = 2 * C * t * x_bytes + 2 * t * E * out_bytes + (C + 8) * E * w_bytes
        return need <= budget

    t = _valid(t_pref)
    while not _fits(t):
        nt = _shrink(t)
        if nt == t:
            break
        t = nt
    while B * ((HW + t - 1) // t) < min_steps:
        nt = _shrink(t)
        if nt == t:
            break
        t = nt
    return t


def _projection_call(x3, w, b2d, *, t, out_dtype, cost, single_buffer_params):
    B, C, HW = x3.shape
    E = w.shape[1]
    n_hw = (HW + t - 1) // t   # ragged last block handled by Pallas (masked stores)

    if single_buffer_params:
        # Constant index_map => resident across the grid; Buffered(1) drops the
        # redundant second VMEM buffer for the weight/bias.
        w_spec = pl.BlockSpec((C, E), lambda b, j: (0, 0), pipeline_mode=pl.Buffered(1))
        b_spec = pl.BlockSpec((1, E), lambda b, j: (0, 0), pipeline_mode=pl.Buffered(1))
    else:
        w_spec = pl.BlockSpec((C, E), lambda b, j: (0, 0))
        b_spec = pl.BlockSpec((1, E), lambda b, j: (0, 0))

    return pl.pallas_call(
        _mlp_kernel,
        out_shape=jax.ShapeDtypeStruct((B, HW, E), out_dtype),
        grid_spec=pltpu.PrefetchScalarGridSpec(
            num_scalar_prefetch=0,
            grid=(B, n_hw),
            in_specs=[
                # (1, C, t) activation tile in native NCHW layout, batch squeezed.
                pl.BlockSpec((None, C, t), lambda b, j: (b, 0, j)),
                w_spec,
                b_spec,
            ],
            out_specs=pl.BlockSpec((None, t, E), lambda b, j: (b, j, 0)),
        ),
        compiler_params=pltpu.CompilerParams(
            dimension_semantics=("parallel", "parallel"),
        ),
        cost_estimate=cost,
    )(x3, w, b2d)


def mlp_forward(x, weight, bias, *, out_dtype=None, t_hw=None):
    """SegFormer MLP head: x.flatten(2).transpose(1, 2) followed by nn.Linear.

    x: (B, C, H, W); weight: (E, C) [PyTorch nn.Linear layout]; bias: (E,).
    Returns (B, H*W, E) in `out_dtype` (default: x.dtype).

    For a pure-bandwidth win pass bf16 x / weight and out_dtype=jnp.bfloat16;
    MXU accumulation stays f32 either way.
    """
    B, C, H, W = x.shape
    E = weight.shape[0]
    HW = H * W
    out_dtype = x.dtype if out_dtype is None else jnp.dtype(out_dtype)

    # Flatten spatial dims only -- keep the channels-second (NCHW) layout in HBM.
    x3 = x.reshape(B, C, HW)
    w = weight.T                      # (C, E) -- tiny one-time parameter transpose
    b2d = bias.reshape(1, E)

    x_bytes = jnp.dtype(x.dtype).itemsize
    w_bytes = jnp.dtype(w.dtype).itemsize
    o_bytes = jnp.dtype(out_dtype).itemsize

    if t_hw is None:
        t = _choose_token_tile(HW, B, C, E, x_bytes, o_bytes, w_bytes)
    else:
        t = HW if t_hw >= HW else max(128, (t_hw // 128) * 128)

    cost = pl.CostEstimate(
        flops=2 * B * HW * C * E,
        transcendentals=0,
        bytes_accessed=B * HW * C * x_bytes
        + (C * E + E) * w_bytes
        + B * HW * E * o_bytes,
    )

    try:
        return _projection_call(x3, w, b2d, t=t, out_dtype=out_dtype, cost=cost,
                                single_buffer_params=True)
    except Exception:
        # Compatibility guard: fall back to default double-buffered params if
        # this JAX build rejects pipeline_mode on a top-level pallas_call.
        return _projection_call(x3, w, b2d, t=t, out_dtype=out_dtype, cost=cost,
                                single_buffer_params=False)


if __name__ == "__main__":
    # Small shapes consistent with the module's forward:
    # batch=2, input_dim C=32, 16x16 spatial -> 256 tokens, embed_dim E=128.
    B, C, H, W = 2, 32, 16, 16
    E = 128

    key = jax.random.PRNGKey(0)
    kx, kw, kb = jax.random.split(key, 3)

    x = jax.random.normal(kx, (B, C, H, W), dtype=jnp.float32)
    # "PyTorch-layout" parameters: weight (E, C), bias (E,)
    weight = jax.random.normal(kw, (E, C), dtype=jnp.float32) * 0.02
    bias = jax.random.normal(kb, (E,), dtype=jnp.float32) * 0.02

    y = jax.block_until_ready(mlp_forward(x, weight, bias))

    # Pure-JAX reference (same math as the PyTorch module).
    tokens_ref = jnp.transpose(x.reshape(B, C, H * W), (0, 2, 1))
    y_ref = tokens_ref @ weight.T + bias
    assert y.shape == (B, H * W, E)
    assert jnp.allclose(y, y_ref, atol=1e-4, rtol=1e-4)

    print("KERNEL_OK")
</pallas_src>

<mosaic_0001>
module attributes {stable_mosaic.version = 11 : i64} {
  func.func @_mlp_kernel(%arg0: i32, %arg1: i32, %arg2: memref<1x32x256xf32, #tpu.memory_space<vmem>>, %arg3: memref<32x128xf32, #tpu.memory_space<vmem>>, %arg4: memref<1x128xf32, #tpu.memory_space<vmem>>, %arg5: memref<1x256x128xf32, #tpu.memory_space<vmem>>) attributes {dimension_semantics = [#tpu.dimension_semantics<parallel>, #tpu.dimension_semantics<parallel>], iteration_bounds = array<i64: 2, 1>, scalar_prefetch = 0 : i64, scratch_operands = 0 : i64, tpu.core_type = #tpu.core_type<tc>, window_params = [{transform_indices = @transform_0, window_bounds = array<i64: 1, 32, 256>}, {pipeline_mode = #tpu.pipeline_mode<synchronous>, transform_indices = @transform_1, window_bounds = array<i64: 32, 128>}, {pipeline_mode = #tpu.pipeline_mode<synchronous>, transform_indices = @transform_2, window_bounds = array<i64: 1, 128>}, {transform_indices = @transform_3, window_bounds = array<i64: 1, 256, 128>}]} {
    %c0 = arith.constant 0 : index
    %c0_0 = arith.constant 0 : index
    %c0_1 = arith.constant 0 : index
    %0 = vector.load %arg2[%c0, %c0_0, %c0_1] : memref<1x32x256xf32, #tpu.memory_space<vmem>>, vector<1x32x256xf32>
    %1 = vector.shape_cast %0 : vector<1x32x256xf32> to vector<32x256xf32>
    %c0_2 = arith.constant 0 : index
    %c0_3 = arith.constant 0 : index
    %2 = vector.load %arg3[%c0_2, %c0_3] : memref<32x128xf32, #tpu.memory_space<vmem>>, vector<32x128xf32>
    %cst = arith.constant dense<0.000000e+00> : vector<256x128xf32>
    %3 = tpu.matmul %1, %2, %cst {dimension_numbers = #tpu.dot_dimension_numbers<[0], [0], [1], [1], [0, 1, 1, 1], [], []>} : vector<32x256xf32>, vector<32x128xf32>, vector<256x128xf32> -> vector<256x128xf32>
    %c0_4 = arith.constant 0 : index
    %c0_5 = arith.constant 0 : index
    %4 = vector.load %arg4[%c0_4, %c0_5] : memref<1x128xf32, #tpu.memory_space<vmem>>, vector<1x128xf32>
    %5 = vector.broadcast %4 : vector<1x128xf32> to vector<256x128xf32>
    %6 = arith.addf %3, %5 : vector<256x128xf32>
    %c0_6 = arith.constant 0 : index
    %c0_7 = arith.constant 0 : index
    %c0_8 = arith.constant 0 : index
    %7 = vector.load %arg5[%c0_6, %c0_7, %c0_8] : memref<1x256x128xf32, #tpu.memory_space<vmem>>, vector<1x256x128xf32>
    %8 = vector.shape_cast %7 : vector<1x256x128xf32> to vector<256x128xf32>
    %9 = vector.shape_cast %6 : vector<256x128xf32> to vector<1x256x128xf32>
    tpu.vector_store %arg5[%c0_6, %c0_7, %c0_8], %9 {strides = array<i32>} : memref<1x256x128xf32, #tpu.memory_space<vmem>>, vector<1x256x128xf32>,
    return
  }
  func.func @transform_0(%arg0: i32, %arg1: i32) -> (i32, i32, i32) {
    %c0_i32 = arith.constant 0 : i32
    %c0_i32_0 = arith.constant 0 : i32
    return %arg0, %c0_i32, %arg1 : i32, i32, i32
  }
  func.func @transform_1(%arg0: i32, %arg1: i32) -> (i32, i32) {
    %c0_i32 = arith.constant 0 : i32
    %c0_i32_0 = arith.constant 0 : i32
    %c0_i32_1 = arith.constant 0 : i32
    return %c0_i32, %c0_i32_0 : i32, i32
  }
  func.func @transform_2(%arg0: i32, %arg1: i32) -> (i32, i32) {
    %c0_i32 = arith.constant 0 : i32
    %c0_i32_0 = arith.constant 0 : i32
    %c0_i32_1 = arith.constant 0 : i32
    return %c0_i32, %c0_i32_0 : i32, i32
  }
  func.func @transform_3(%arg0: i32, %arg1: i32) -> (i32, i32, i32) {
    %c0_i32 = arith.constant 0 : i32
    %c0_i32_0 = arith.constant 0 : i32
    return %arg0, %arg1, %c0_i32 : i32, i32, i32
  }
}

module attributes {stable_mosaic.version = 11 : i64} {
  func.func @_mlp_kernel(%arg0: i32, %arg1: i32, %arg2: memref<1x32x256xf32, #tpu.memory_space<vmem>>, %arg3: memref<32x128xf32, #tpu.memory_space<vmem>>, %arg4: memref<1x128xf32, #tpu.memory_space<vmem>>, %arg5: memref<1x256x128xf32, #tpu.memory_space<vmem>>) attributes {dimension_semantics = [#tpu.dimension_semantics<parallel>, #tpu.dimension_semantics<parallel>], iteration_bounds = array<i64: 2, 1>, scalar_prefetch = 0 : i64, scratch_operands = 0 : i64, tpu.core_type = #tpu.core_type<tc>, window_params = [{transform_indices = @transform_0, window_bounds = array<i64: 1, 32, 256>}, {pipeline_mode = #tpu.pipeline_mode<synchronous>, transform_indices = @transform_1, window_bounds = array<i64: 32, 128>}, {pipeline_mode = #tpu.pipeline_mode<synchronous>, transform_indices = @transform_2, window_bounds = array<i64: 1, 128>}, {transform_indices = @transform_3, window_bounds = array<i64: 1, 256, 128>}]} {
    %c0 = arith.constant 0 : index
    %c0_0 = arith.constant 0 : index
    %c0_1 = arith.constant 0 : index
    %0 = vector.load %arg2[%c0, %c0_0, %c0_1] : memref<1x32x256xf32, #tpu.memory_space<vmem>>, vector<1x32x256xf32>
    %1 = vector.shape_cast %0 : vector<1x32x256xf32> to vector<32x256xf32>
    %c0_2 = arith.constant 0 : index
    %c0_3 = arith.constant 0 : index
    %2 = vector.load %arg3[%c0_2, %c0_3] : memref<32x128xf32, #tpu.memory_space<vmem>>, vector<32x128xf32>
    %cst = arith.constant dense<0.000000e+00> : vector<256x128xf32>
    %3 = tpu.matmul %1, %2, %cst {dimension_numbers = #tpu.dot_dimension_numbers<[0], [0], [1], [1], [0, 1, 1, 1], [], []>} : vector<32x256xf32>, vector<32x128xf32>, vector<256x128xf32> -> vector<256x128xf32>
    %c0_4 = arith.constant 0 : index
    %c0_5 = arith.constant 0 : index
    %4 = vector.load %arg4[%c0_4, %c0_5] : memref<1x128xf32, #tpu.memory_space<vmem>>, vector<1x128xf32>
    %5 = vector.broadcast %4 : vector<1x128xf32> to vector<256x128xf32>
    %6 = arith.addf %3, %5 : vector<256x128xf32>
    %c0_6 = arith.constant 0 : index
    %c0_7 = arith.constant 0 : index
    %c0_8 = arith.constant 0 : index
    %7 = vector.load %arg5[%c0_6, %c0_7, %c0_8] : memref<1x256x128xf32, #tpu.memory_space<vmem>>, vector<1x256x128xf32>
    %8 = vector.shape_cast %7 : vector<1x256x128xf32> to vector<256x128xf32>
    %9 = vector.shape_cast %6 : vector<256x128xf32> to vector<1x256x128xf32>
    tpu.vector_store %arg5[%c0_6, %c0_7, %c0_8], %9 {strides = array<i32>} : memref<1x256x128xf32, #tpu.memory_space<vmem>>, vector<1x256x128xf32>,
    return
  }
  func.func @transform_0(%arg0: i32, %arg1: i32) -> (i32, i32, i32) {
    %c0_i32 = arith.constant 0 : i32
    %c0_i32_0 = arith.constant 0 : i32
    return %arg0, %c0_i32, %arg1 : i32, i32, i32
  }
  func.func @transform_1(%arg0: i32, %arg1: i32) -> (i32, i32) {
    %c0_i32 = arith.constant 0 : i32
    %c0_i32_0 = arith.constant 0 : i32
    %c0_i32_1 = arith.constant 0 : i32
    return %c0_i32, %c0_i32_0 : i32, i32
  }
  func.func @transform_2(%arg0: i32, %arg1: i32) -> (i32, i32) {
    %c0_i32 = arith.constant 0 : i32
    %c0_i32_0 = arith.constant 0 : i32
    %c0_i32_1 = arith.constant 0 : i32
    return %c0_i32, %c0_i32_0 : i32, i32
  }
  func.func @transform_3(%arg0: i32, %arg1: i32) -> (i32, i32, i32) {
    %c0_i32 = arith.constant 0 : i32
    %c0_i32_0 = arith.constant 0 : i32
    return %arg0, %arg1, %c0_i32 : i32, i32, i32
  }
}

</mosaic_0001>

<bundles_post_ra>
// kernel: tpu_custom_call.1
= control target key start
LH: loop header
LB: loop body
LE: loop exit
PB: predicated region body
PF: predicated region fallthrough
CT: control target
= control target key end

     0   :  { %8 = vsyncpa [#allocation3], 0  ;;  %s1509_s0 = inlined_call_operand.hbm [shape: f32[2,32,256], index: 0, kind: input, shape index: {}]   ;;  %s1510_s1 = inlined_call_operand.hbm [shape: f32[32,128], index: 1, kind: input, shape index: {}]   ;;  %s1511_s2 = inlined_call_operand.vmem [shape: f32[1,128], index: 2, kind: input, shape index: {}]   ;;  %s1512_s3 = inlined_call_operand.hbm [shape: f32[2,256,128], index: 3, kind: output, shape index: {}]  }
   0x1   :  { %10 = vsyncpa [#allocation3 + $0x1], 0 }
   0x2   :  { %11 = vsyncpa [#allocation6], 0 }
   0x3   :  { %12 = vsyncpa [#allocation4], 0 }
   0x4   :  { %14 = vsyncpa [#allocation4 + $0x1], 0  ;;  %s1185_s12 = smov 0   ;;  %s1187_s13 = smov 0  }
   0x5   :  { %s1189_s14 = smov 0   ;;  %s1191_s15 = smov 0  }
   0x6   :  { %s1193_s16 = smov 0   ;;  %s1195_s17 = smov 0  }
   0x7 LB: > { %s774_s18 = sadd.s32 4294967295, %s1154_s17   ;;  %s775_s19 = sadd.s32 4294967294, %s1154_s17   ;;  %s1154_s17 = sphi %s1195_s17, %s20_s17   ;;  %s1150_s16 = sphi %s1193_s16, %s1536_s16   ;;  %s1146_s15 = sphi %s1191_s15, %s1535_s15   ;;  %s1142_s14 = sphi %s1189_s14, %s1534_s14   ;;  %s1138_s13 = sphi %s1187_s13, %s1533_s13   ;;  %s1134_s12 = sphi %s1185_s12, %s1532_s12  }
   0x8   : > { %p54_p0 = scmp.ne.s32.totalorder %s1138_s13, %s1134_s12  ;;  %p1219_p1 = scmp.eq.s32.totalorder %s774_s18, 0 }
   0x9   : > { %p1223_p2 = scmp.eq.s32.totalorder %s774_s18, 1  ;;  %p128_p3 = scmp.eq.s32.totalorder %s775_s19, 1 }
   0xa   : > { %s1517_s20 = scalar_select %p1219_p1, 1, 0 }
   0xb   : > { %s1518_s21 = scalar_select %p1223_p2, 1, 0 }
   0xc   : > { %p1229_p4 = por %p1219_p1, %p54_p0  ;;  %p776_p5 = scmp.ge.s32.totalorder %s1154_s17, 1 }
   0xd   : > { %p1234_p6 = por %p128_p3, %p54_p0  ;;  %p135_p7 = scmp.lt.s32.totalorder %s1154_s17, 3 }
   0xe   : > { %s1519_s22 = scalar_select %p1229_p4, 1, 0 }
   0xf   : > { %s1520_s23 = scalar_select %p1234_p6, 1, 0 }
  0x10   : > { %p1239_p8 = pnand %p776_p5, %p135_p7  ;;  %s1156_s25 = smov [#allocation5]  }
  0x11   : > { %s147_s26 = sshll.u32 %s1156_s25, 4  ;;  %s32_s28 = sadd.s32 1, %s1150_s16  ;;  %s148_s26 = int_to_ptr.vmem [resolvable:$true] %s147_s26 }
  0x12   : > { %s1521_s24 = scalar_select %p1239_p8, 1, 0 }
  0x13   : > { %p938_p9 = pneg %p1239_p8  ;;  %s1010_s4 = scalar_lea.hbm %s1510_s1, 512 }
  0x14   : > { %p1011_p12 = scmp.ne.s32.totalorder %s1510_s1, %s1010_s4  ;;  %p1017_p5 = scmp.lt.u32.totalorder %s1010_s4, %s1510_s1 }
  0x15   : > { %p1248_p11 = pnand %p938_p9, %p1219_p1 }
  0x17   : > { %p1012_p13 = pneg %p1248_p11 }
  0x19   : > { %p1013_p0 = pnand %p1012_p13, %p1011_p12 }
  0x1b   : > { %p1014_p3 = pneg %p1013_p0 }
  0x1d   : > { %p1019_p7 = pnand %p1017_p5, %p1014_p3 }
  0x1f   : > { %1022 = shalt.err (!%p1019_p7)
}
  0x20   : > { %s1023_s9 = scalar_lea.vmem %s148_s26, 512  ;;  %p1031_p1 = scmp.lt.s32.totalorder %s148_s26, %s148_s26 }
  0x21   : > { %p1024_p9 = scmp.ne.s32.totalorder %s148_s26, %s1023_s9  ;;  %p1032_p4 = scmp.lt.s32.totalorder %s1023_s9, %s1023_s9 }
  0x23   : > { %p1026_p10 = pnand %p1024_p9, %p1012_p13  ;;  %p1033_p8 = por %p1032_p4, %p1031_p1 }
  0x25   : > { %p1027_p6 = pneg %p1026_p10 }
  0x27   : > { %p1034_p2 = pnand %p1033_p8, %p1027_p6 }
  0x29   : > { %1037 = shalt.err (!%p1034_p2)
}
  0x2a   : > { %s1157_s10 = smov 128   ;;  %s1158_s11 = smov 8  }
  0x2b   : > { %941 = dma.hbm_to_vmem [thread:$0]  (!%p1248_p11), %s1510_s1, 512, %s148_s26, [#allocation6], %s1157_s10, %s1157_s10, %s1158_s11  }
  0x2c   : > { %p34_p1 = scmp.ge.s32.totalorder %s32_s28, 2  ;;  %s41_s25 = sadd.s32 1, %s1142_s14 }
  0x2d   : > { %p48_p2 = scmp.ne.s32.totalorder %s1142_s14, %s1138_s13  ;;  %p49_p4 = scmp.eq.s32.totalorder %s1154_s17, 0 }
  0x2e   : > { %s1538_s28 = smov (%p34_p1, %s32_s28), 0  ;;  %p1524_p8 = scmp.ne.s32.totalorder %s1518_s21, 0 }
  0x2f   : > { %p1275_p6 = por %p49_p4, %p48_p2  ;;  %s36_s27 = ssub.s32 %s1150_s16, %s1538_s28 }
  0x30   : > { %p1281_p10 = por %p1524_p8, %p48_p2  ;;  %p951_p12 = scmp.lt.s32.totalorder %s1154_s17, 2 }
  0x31   : > { %p39_p11 = scmp.eq.s32.totalorder %s36_s27, 0  ;;  %s164_s26 = sand.u32 1, %s1142_s14  }
  0x32   : > { %s779_s4 = sshll.u32 %s164_s26, 6  ;;  %s824_s6 = sshll.u32 %s1150_s16, 10 }
  0x33   : > { %s1290_s5 = scalar_select %p39_p11, %s1142_s14, %s41_s25  }
  0x34   : > { %s1296_s9 = scalar_lea.hbm %s1509_s0, %s824_s6  ;;  %s168_s21 = scalar_lea.vmem [#allocation2], %s779_s4 }
  0x35   : > { %s177_s10 = sshll.u32 %s168_s21, 4  ;;  %p1302_p13 = pnand %p951_p12, %p1275_p6  ;;  %s1298_s10 = int_to_ptr.vmem [resolvable:$true] %s177_s10 }
  0x36   : > { %s1306_s18 = scalar_lea.sflag [#allocation3], %s164_s26  ;;  %s1038_s19 = scalar_lea.hbm %s1296_s9, 1024 }
  0x37   : > { %p1039_p0 = scmp.ne.s32.totalorder %s1296_s9, %s1038_s19  ;;  %p1040_p3 = pneg %p1302_p13 }
  0x38   : > { %s1043_s29 = scalar_lea.hbm %s1509_s0, 2048  ;;  %p1044_p9 = scmp.lt.u32.totalorder %s1296_s9, %s1509_s0 }
  0x39   : > { %p1041_p5 = pnand %p1040_p3, %p1039_p0  ;;  %p1045_p1 = scmp.lt.u32.totalorder %s1043_s29, %s1038_s19 }
  0x3a   : > { %p1047_p4 = scmp.lt.u32.totalorder %s1038_s19, %s1296_s9 }
  0x3b   : > { %p1042_p7 = pneg %p1041_p5  ;;  %p1046_p2 = por %p1045_p1, %p1044_p9 }
  0x3d   : > { %p1048_p6 = por %p1047_p4, %p1046_p2 }
  0x3f   : > { %p1049_p8 = pnand %p1048_p6, %p1042_p7 }
  0x41   : > { %1052 = shalt.err (!%p1049_p8)
}
  0x42   : > { %s1053_s26 = scalar_lea.vmem %s1298_s10, 1024  ;;  %s1159_s7 = smov [#allocation2]  }
  0x43   : > { %p1054_p12 = scmp.ne.s32.totalorder %s1298_s10, %s1053_s26  ;;  %s1058_s8 = sshll.u32 %s1159_s7, 4  ;;  %s1059_s8 = int_to_ptr.vmem [resolvable:$false] %s1058_s8 }
  0x44   : > { %s1060_s21 = scalar_lea.vmem %s1059_s8, 2048  ;;  %p1061_p5 = scmp.lt.s32.totalorder %s1298_s10, %s1059_s8 }
  0x45   : > { %p1056_p11 = pnand %p1054_p12, %p1040_p3  ;;  %p1062_p9 = scmp.lt.s32.totalorder %s1060_s21, %s1053_s26 }
  0x47   : > { %p1057_p0 = pneg %p1056_p11  ;;  %p1063_p1 = por %p1062_p9, %p1061_p5 }
  0x49   : > { %p1064_p2 = pnand %p1063_p1, %p1057_p0 }
  0x4b   : > { %1067 = shalt.err (!%p1064_p2)
}
  0x4c   : > { %s1160_s19 = smov 256   ;;  %s1161_s25 = smov 16  }
  0x4d   : > { %945 = dma.hbm_to_vmem [thread:$0]  (!%p1302_p13), %s1296_s9, 1024, %s1298_s10, %s1306_s18, %s1160_s19, %s1160_s19, %s1161_s25  }
  0x4e   : > { %p1527_p3 = scmp.ne.s32.totalorder %s1521_s24, 0 }
  0x4f   : > { %s1337_s27 = sand.u32 (!%p1527_p3), 1, %s1138_s13   ;;  %p1528_p7 = scmp.ne.s32.totalorder (!%p1527_p3), %s1519_s22, 0 }
  0x50   : > { %189 = sbr.rel (%p1527_p3) target bundleno = 511 (0x1ff), region = 32  ;;  %s783_s29 = sshll.u32 (!%p1527_p3), %s1337_s27, 6 }
  0x51   : > { %s192_s4 = scalar_lea.sflag (!%p1527_p3), [#allocation3], %s1337_s27  ;;  %s195_s6 = scalar_lea.vmem (!%p1527_p3), [#allocation2], %s783_s29 }
  0x57   : > { %1121 = dma.done.wait (%p1528_p7), %s192_s4, 1024  }
  0x58   : > { %1123 = vsyncadd (%p1528_p7), %s192_s4, 4294966272  ;;  %p1529_p4 = scmp.ne.s32.totalorder %s1517_s20, 0 }
  0x5a   : > { %1125 = dma.done.wait (%p1529_p4), [#allocation6], 512  }
  0x5b   : > { %1127 = vsyncadd (%p1529_p4), [#allocation6], 4294966784  ;;  %v225_v0 = vld [vmem:[%s195_s6 + $0x8] sm:$0xff]  ;;  %v224_v1 = vld [vmem:[%s195_s6] sm:$0xff]  ;;  %vm307_vm0 = vcmask 261120   ;;  %s785_s20 = sshll.u32 %s1337_s27, 8 }
  0x5c   : > { %275 = vxpose.xlu1.b32.start [1/4] (short) %v225_v0, 128  ;;  %243 = vxpose.xlu0.b32.start [1/4] (short) %v224_v1, 128  ;;  %v227_v2 = vld [vmem:[%s195_s6 + $0x18] sm:$0xff]  ;;  %v226_v3 = vld [vmem:[%s195_s6 + $0x10] sm:$0xff]  ;;  %v232_v4 = vld [vmem:[#allocation5] sm:$0xff]  ;;  %s1391_s9 = scalar_lea.vmem [#allocation7], %s785_s20  ;;  %s825_s10 = sshll.u32 %s1146_s15, 12 }
  0x5d   : > { %v233_v5 = vld [vmem:[#allocation5 + $0x8] sm:$0xff]  ;;  %v234_v6 = vld [vmem:[#allocation5 + $0x10] sm:$0xff]  ;;  %v235_v7 = vld [vmem:[#allocation5 + $0x18] sm:$0xff]  ;;  %s677_s11 = sshll.u32 %s1391_s9, 4  ;;  %s1452_s7 = scalar_lea.hbm %s1512_s3, %s825_s10  ;;  %s1454_s11 = int_to_ptr.vmem [resolvable:$true] %s677_s11 }
  0x5e   : > { %v918_v8 = vpack.c.bf16 %v233_v5, %v232_v4  ;;  %v922_v9 = vpack.c.bf16 %v235_v7, %v234_v6  ;;  %v229_v10 = vld [vmem:[%s195_s6 + $0x28] sm:$0xff]  ;;  %v228_v11 = vld [vmem:[%s195_s6 + $0x20] sm:$0xff]  ;;  %v231_v12 = vld [vmem:[%s195_s6 + $0x38] sm:$0xff]  ;;  %s662_s15 = scalar_lea.sflag [#allocation4], %s1337_s27  ;;  %s1068_s8 = scalar_lea.vmem %s1454_s11, 4096 }
  0x5f   : > { %v230_v13 = vld [vmem:[%s195_s6 + $0x30] sm:$0xff]  ;;  %v1385_v46 = vld [vmem:[%s1511_s2] ss:$0 sm:$0xff]  ;;  %p1069_p13 = scmp.ne.s32.totalorder %s1454_s11, %s1068_s8  ;;  %s1162_s21 = smov [#allocation7]  }
  0x60   : > { %276 = vxpose.xlu1.b32.cont [2/4] (short) %v227_v2, 128  ;;  %244 = vxpose.xlu0.b32.cont [2/4] (short) %v226_v3, 128  ;;  %s1072_s19 = sshll.u32 %s1162_s21, 4  ;;  %s1073_s19 = int_to_ptr.vmem [resolvable:$false] %s1072_s19 }
  0x61   : > { %919 = vmatprep.subr.bf16.mxu0 %v918_v8  ;;  %926 = vmatprep.subr.bf16.mxu1 %v918_v8  ;;  %p1070_p6 = pnand %p1069_p13, %p1281_p10  ;;  %s1074_s25 = scalar_lea.vmem %s1073_s19, 8192 }
  0x62   : > { %921 = vmatpush3.bf16.msra.mxu0 %v918_v8  ;;  %928 = vmatpush3.bf16.msra.mxu1 %v918_v8  ;;  %p1075_p12 = scmp.lt.s32.totalorder %s1454_s11, %s1073_s19  ;;  %p1076_p11 = scmp.lt.s32.totalorder %s1074_s25, %s1068_s8 }
  0x63   : > { %923 = vmatprep.subr.bf16.mxu0 %v922_v9  ;;  %927 = vmatprep.subr.bf16.mxu1 %v922_v9  ;;  %p1071_p8 = pneg %p1070_p6 }
  0x64   : > { %277 = vxpose.xlu1.b32.cont [3/4] (short) %v229_v10, 128  ;;  %245 = vxpose.xlu0.b32.cont [3/4] (short) %v228_v11, 128  ;;  %p1077_p0 = por %p1076_p11, %p1075_p12 }
  0x66   : > { %925 = vmatpush3.bf16.msra.mxu0 %v922_v9  ;;  %929 = vmatpush3.bf16.msra.mxu1 %v922_v9  ;;  %p1078_p5 = pnand %p1077_p0, %p1071_p8 }
  0x68   : > { %278 = vxpose.xlu1.b32.end [4/4] (short) %v231_v12, 128  ;;  %246 = vxpose.xlu0.b32.end [4/4] (short) %v230_v13, 128 }
  0xdc   : > { %v291_v14 = vpop.trf.xlu1  ;;  %v259_v15 = vpop.trf.xlu0 }
  0xdd   : > { %870 = vmatprep.mubr.msk.f32.mxu0 %vm307_vm0, %v259_v15  ;;  %894 = vmatprep.mubr.msk.f32.mxu1 %vm307_vm0, %v291_v14 }
  0xe0   : > { %v292_v16 = vpop.trf.xlu1  ;;  %v260_v17 = vpop.trf.xlu0 }
  0xe1   : > { %871 = vmatmul.mubr.msk.f32.vlgmr.msra.gmra.mrb[0].mxu0 %vm307_vm0, %v260_v17  ;;  %895 = vmatmul.mubr.msk.f32.vlgmr.msra.gmra.mrb[0].mxu1 %vm307_vm0, %v292_v16 }
  0xe4   : > { %v293_v18 = vpop.trf.xlu1  ;;  %v261_v19 = vpop.trf.xlu0 }
  0xe5   : > { %873 = vmatprep.mubr.msk.f32.mxu0 %vm307_vm0, %v261_v19  ;;  %897 = vmatprep.mubr.msk.f32.mxu1 %vm307_vm0, %v293_v18 }
  0xe8   : > { %v294_v20 = vpop.trf.xlu1  ;;  %v262_v21 = vpop.trf.xlu0 }
  0xe9   : > { %874 = vmatmul.mubr.msk.f32.gmra.mrb[2].mxu0 %vm307_vm0, %v262_v21  ;;  %898 = vmatmul.mubr.msk.f32.gmra.mrb[2].mxu1 %vm307_vm0, %v294_v20 }
  0xec   : > { %v295_v22 = vpop.trf.xlu1  ;;  %v263_v23 = vpop.trf.xlu0 }
  0xed   : > { %876 = vmatprep.mubr.msk.f32.mxu0 %vm307_vm0, %v263_v23  ;;  %900 = vmatprep.mubr.msk.f32.mxu1 %vm307_vm0, %v295_v22 }
  0xf0   : > { %v296_v24 = vpop.trf.xlu1  ;;  %v264_v25 = vpop.trf.xlu0 }
  0xf1   : > { %877 = vmatmul.mubr.msk.f32.gmra.mrb[4].mxu0 %vm307_vm0, %v264_v25  ;;  %901 = vmatmul.mubr.msk.f32.gmra.mrb[4].mxu1 %vm307_vm0, %v296_v24 }
  0xf4   : > { %v297_v26 = vpop.trf.xlu1  ;;  %v265_v27 = vpop.trf.xlu0 }
  0xf5   : > { %879 = vmatprep.mubr.msk.f32.mxu0 %vm307_vm0, %v265_v27  ;;  %903 = vmatprep.mubr.msk.f32.mxu1 %vm307_vm0, %v297_v26 }
  0xf8   : > { %v298_v28 = vpop.trf.xlu1  ;;  %v266_v29 = vpop.trf.xlu0 }
  0xf9   : > { %880 = vmatmul.mubr.msk.f32.gmra.mrb[6].mxu0 %vm307_vm0, %v266_v29  ;;  %904 = vmatmul.mubr.msk.f32.gmra.mrb[6].mxu1 %vm307_vm0, %v298_v28 }
  0xfc   : > { %v299_v30 = vpop.trf.xlu1  ;;  %v267_v31 = vpop.trf.xlu0 }
  0xfd   : > { %882 = vmatprep.mubr.msk.f32.mxu0 %vm307_vm0, %v267_v31  ;;  %906 = vmatprep.mubr.msk.f32.mxu1 %vm307_vm0, %v299_v30 }
 0x100   : > { %v300_v32 = vpop.trf.xlu1  ;;  %v268_v33 = vpop.trf.xlu0 }
 0x101   : > { %883 = vmatmul.mubr.msk.f32.gmra.mrb[8].mxu0 %vm307_vm0, %v268_v33  ;;  %907 = vmatmul.mubr.msk.f32.gmra.mrb[8].mxu1 %vm307_vm0, %v300_v32 }
 0x104   : > { %v301_v34 = vpop.trf.xlu1  ;;  %v269_v35 = vpop.trf.xlu0 }
 0x105   : > { %885 = vmatprep.mubr.msk.f32.mxu0 %vm307_vm0, %v269_v35  ;;  %909 = vmatprep.mubr.msk.f32.mxu1 %vm307_vm0, %v301_v34 }
 0x108   : > { %v302_v36 = vpop.trf.xlu1  ;;  %v270_v37 = vpop.trf.xlu0 }
 0x109   : > { %886 = vmatmul.mubr.msk.f32.gmra.mrb[10].mxu0 %vm307_vm0, %v270_v37  ;;  %910 = vmatmul.mubr.msk.f32.gmra.mrb[10].mxu1 %vm307_vm0, %v302_v36 }
 0x10c   : > { %v303_v38 = vpop.trf.xlu1  ;;  %v271_v39 = vpop.trf.xlu0 }
 0x10d   : > { %888 = vmatprep.mubr.msk.f32.mxu0 %vm307_vm0, %v271_v39  ;;  %912 = vmatprep.mubr.msk.f32.mxu1 %vm307_vm0, %v303_v38 }
 0x110   : > { %v304_v40 = vpop.trf.xlu1  ;;  %v272_v41 = vpop.trf.xlu0 }
 0x111   : > { %889 = vmatmul.mubr.msk.f32.gmra.mrb[12].mxu0 %vm307_vm0, %v272_v41  ;;  %913 = vmatmul.mubr.msk.f32.gmra.mrb[12].mxu1 %vm307_vm0, %v304_v40 }
 0x114   : > { %v305_v42 = vpop.trf.xlu1  ;;  %v273_v43 = vpop.trf.xlu0 }
 0x115   : > { %891 = vmatprep.mubr.msk.f32.mxu0 %vm307_vm0, %v273_v43  ;;  %915 = vmatprep.mubr.msk.f32.mxu1 %vm307_vm0, %v305_v42 }
 0x118   : > { %v306_v44 = vpop.trf.xlu1  ;;  %v274_v45 = vpop.trf.xlu0 }
 0x119   : > { %892 = vmatmul.mubr.msk.f32.gmra.mrb[14].mxu0 %vm307_vm0, %v274_v45  ;;  %916 = vmatmul.mubr.msk.f32.gmra.mrb[14].mxu1 %vm307_vm0, %v306_v44 }
 0x1b4   : > { %v872_v47 = vpop.f32.mrb[0].mxu0  ;;  %v896_v48 = vpop.f32.mrb[0].mxu1 }
 0x1b5   : > { %v476_v49 = vadd.f32 %v872_v47, %v1385_v46  ;;  %v556_v50 = vadd.f32 %v896_v48, %v1385_v46  ;;  %v470_v51 = vpop.f32.mrb[1].mxu0  ;;  %v550_v52 = vpop.f32.mrb[1].mxu1 }
 0x1b6   : > { %v471_v53 = vadd.f32 %v1385_v46, %v470_v51  ;;  %v551_v54 = vadd.f32 %v1385_v46, %v550_v52 }
 0x1b7   : > { %630 = vst [vmem:[%s1391_s9 + $0x8] sm:$0xff] %v476_v49  ;;  %646 = vst [vmem:[%s1391_s9 + $0x88] sm:$0xff] %v556_v50 }
 0x1b8   : > { %629 = vst [vmem:[%s1391_s9] sm:$0xff] %v471_v53  ;;  %645 = vst [vmem:[%s1391_s9 + $0x80] sm:$0xff] %v551_v54 }
 0x1bc   : > { %v875_v55 = vpop.f32.mrb[2].mxu0  ;;  %v899_v56 = vpop.f32.mrb[2].mxu1 }
 0x1bd   : > { %v486_v57 = vadd.f32 %v875_v55, %v1385_v46  ;;  %v566_v58 = vadd.f32 %v899_v56, %v1385_v46  ;;  %v480_v59 = vpop.f32.mrb[3].mxu0  ;;  %v560_v60 = vpop.f32.mrb[3].mxu1 }
 0x1be   : > { %v481_v61 = vadd.f32 %v1385_v46, %v480_v59  ;;  %v561_v62 = vadd.f32 %v1385_v46, %v560_v60 }
 0x1bf   : > { %632 = vst [vmem:[%s1391_s9 + $0x18] sm:$0xff] %v486_v57  ;;  %648 = vst [vmem:[%s1391_s9 + $0x98] sm:$0xff] %v566_v58 }
 0x1c0   : > { %631 = vst [vmem:[%s1391_s9 + $0x10] sm:$0xff] %v481_v61  ;;  %647 = vst [vmem:[%s1391_s9 + $0x90] sm:$0xff] %v561_v62 }
 0x1c4   : > { %v878_v63 = vpop.f32.mrb[4].mxu0  ;;  %v902_v0 = vpop.f32.mrb[4].mxu1 }
 0x1c5   : > { %v496_v1 = vadd.f32 %v878_v63, %v1385_v46  ;;  %v576_v2 = vadd.f32 %v902_v0, %v1385_v46  ;;  %v490_v3 = vpop.f32.mrb[5].mxu0  ;;  %v570_v4 = vpop.f32.mrb[5].mxu1 }
 0x1c6   : > { %v491_v5 = vadd.f32 %v1385_v46, %v490_v3  ;;  %v571_v6 = vadd.f32 %v1385_v46, %v570_v4 }
 0x1c7   : > { %634 = vst [vmem:[%s1391_s9 + $0x28] sm:$0xff] %v496_v1  ;;  %650 = vst [vmem:[%s1391_s9 + $0xa8] sm:$0xff] %v576_v2 }
 0x1c8   : > { %633 = vst [vmem:[%s1391_s9 + $0x20] sm:$0xff] %v491_v5  ;;  %649 = vst [vmem:[%s1391_s9 + $0xa0] sm:$0xff] %v571_v6 }
 0x1cc   : > { %v881_v7 = vpop.f32.mrb[6].mxu0  ;;  %v905_v8 = vpop.f32.mrb[6].mxu1 }
 0x1cd   : > { %v506_v9 = vadd.f32 %v881_v7, %v1385_v46  ;;  %v586_v10 = vadd.f32 %v905_v8, %v1385_v46  ;;  %v500_v11 = vpop.f32.mrb[7].mxu0  ;;  %v580_v12 = vpop.f32.mrb[7].mxu1 }
 0x1ce   : > { %v501_v13 = vadd.f32 %v1385_v46, %v500_v11  ;;  %v581_v14 = vadd.f32 %v1385_v46, %v580_v12 }
 0x1cf   : > { %636 = vst [vmem:[%s1391_s9 + $0x38] sm:$0xff] %v506_v9  ;;  %652 = vst [vmem:[%s1391_s9 + $0xb8] sm:$0xff] %v586_v10 }
 0x1d0   : > { %635 = vst [vmem:[%s1391_s9 + $0x30] sm:$0xff] %v501_v13  ;;  %651 = vst [vmem:[%s1391_s9 + $0xb0] sm:$0xff] %v581_v14 }
 0x1d4   : > { %v884_v15 = vpop.f32.mrb[8].mxu0  ;;  %v908_v16 = vpop.f32.mrb[8].mxu1 }
 0x1d5   : > { %v516_v17 = vadd.f32 %v884_v15, %v1385_v46  ;;  %v596_v18 = vadd.f32 %v908_v16, %v1385_v46  ;;  %v510_v19 = vpop.f32.mrb[9].mxu0  ;;  %v590_v20 = vpop.f32.mrb[9].mxu1 }
 0x1d6   : > { %v511_v21 = vadd.f32 %v1385_v46, %v510_v19  ;;  %v591_v22 = vadd.f32 %v1385_v46, %v590_v20 }
 0x1d7   : > { %638 = vst [vmem:[%s1391_s9 + $0x48] sm:$0xff] %v516_v17  ;;  %654 = vst [vmem:[%s1391_s9 + $0xc8] sm:$0xff] %v596_v18 }
 0x1d8   : > { %637 = vst [vmem:[%s1391_s9 + $0x40] sm:$0xff] %v511_v21  ;;  %653 = vst [vmem:[%s1391_s9 + $0xc0] sm:$0xff] %v591_v22 }
 0x1dc   : > { %v887_v23 = vpop.f32.mrb[10].mxu0  ;;  %v911_v24 = vpop.f32.mrb[10].mxu1 }
 0x1dd   : > { %v526_v25 = vadd.f32 %v887_v23, %v1385_v46  ;;  %v606_v26 = vadd.f32 %v911_v24, %v1385_v46  ;;  %v520_v27 = vpop.f32.mrb[11].mxu0  ;;  %v600_v28 = vpop.f32.mrb[11].mxu1 }
 0x1de   : > { %v521_v29 = vadd.f32 %v1385_v46, %v520_v27  ;;  %v601_v30 = vadd.f32 %v1385_v46, %v600_v28 }
 0x1df   : > { %640 = vst [vmem:[%s1391_s9 + $0x58] sm:$0xff] %v526_v25  ;;  %656 = vst [vmem:[%s1391_s9 + $0xd8] sm:$0xff] %v606_v26 }
 0x1e0   : > { %639 = vst [vmem:[%s1391_s9 + $0x50] sm:$0xff] %v521_v29  ;;  %655 = vst [vmem:[%s1391_s9 + $0xd0] sm:$0xff] %v601_v30 }
 0x1e4   : > { %v890_v31 = vpop.f32.mrb[12].mxu0  ;;  %v914_v32 = vpop.f32.mrb[12].mxu1 }
 0x1e5   : > { %v536_v33 = vadd.f32 %v890_v31, %v1385_v46  ;;  %v616_v34 = vadd.f32 %v914_v32, %v1385_v46  ;;  %v530_v35 = vpop.f32.mrb[13].mxu0  ;;  %v610_v36 = vpop.f32.mrb[13].mxu1 }
 0x1e6   : > { %v531_v37 = vadd.f32 %v1385_v46, %v530_v35  ;;  %v611_v38 = vadd.f32 %v1385_v46, %v610_v36 }
 0x1e7   : > { %642 = vst [vmem:[%s1391_s9 + $0x68] sm:$0xff] %v536_v33  ;;  %658 = vst [vmem:[%s1391_s9 + $0xe8] sm:$0xff] %v616_v34 }
 0x1e8   : > { %641 = vst [vmem:[%s1391_s9 + $0x60] sm:$0xff] %v531_v37  ;;  %657 = vst [vmem:[%s1391_s9 + $0xe0] sm:$0xff] %v611_v38 }
 0x1ec   : > { %v893_v39 = vpop.f32.mrb[14].mxu0  ;;  %v917_v40 = vpop.f32.mrb[14].mxu1 }
 0x1ed   : > { %v546_v41 = vadd.f32 %v893_v39, %v1385_v46  ;;  %v626_v42 = vadd.f32 %v917_v40, %v1385_v46  ;;  %v540_v43 = vpop.f32.mrb[15].mxu0  ;;  %v620_v44 = vpop.f32.mrb[15].mxu1 }
 0x1ee   : > { %v541_v45 = vadd.f32 %v1385_v46, %v540_v43  ;;  %v621_v47 = vadd.f32 %v1385_v46, %v620_v44 }
 0x1ef   : > { %644 = vst [vmem:[%s1391_s9 + $0x78] sm:$0xff] %v546_v41  ;;  %660 = vst [vmem:[%s1391_s9 + $0xf8] sm:$0xff] %v626_v42 }
 0x1f0   : > { %643 = vst [vmem:[%s1391_s9 + $0x70] sm:$0xff] %v541_v45  ;;  %659 = vst [vmem:[%s1391_s9 + $0xf0] sm:$0xff] %v621_v47 }
 0x1f1   : > { %1081 = shalt.err (!%p1078_p5)
}
 0x1f2   : > { %s1082_s29 = scalar_lea.hbm %s1452_s7, 4096  ;;  %s1086_s20 = scalar_lea.hbm %s1512_s3, 8192 }
 0x1f3   : > { %p1083_p9 = scmp.ne.s32.totalorder %s1452_s7, %s1082_s29  ;;  %p1087_p3 = scmp.lt.u32.totalorder %s1452_s7, %s1512_s3 }
 0x1f4   : > { %p1088_p7 = scmp.lt.u32.totalorder %s1086_s20, %s1082_s29  ;;  %p1090_p13 = scmp.lt.u32.totalorder %s1082_s29, %s1452_s7 }
 0x1f5   : > { %p1084_p1 = pnand %p1083_p9, %p1281_p10 }
 0x1f6   : > { %p1089_p4 = por %p1088_p7, %p1087_p3 }
 0x1f7   : > { %p1085_p2 = pneg %p1084_p1 }
 0x1f8   : > { %p1091_p6 = por %p1090_p13, %p1089_p4 }
 0x1fa   : > { %p1092_p8 = pnand %p1091_p6, %p1085_p2 }
 0x1fc   : > { %1095 = shalt.err (!%p1092_p8)
}
 0x1fd   : > { %s1163_s9 = smov 128   ;;  %s1164_s10 = smov 8  }
 0x1fe   : > { %936 = dma.vmem_to_hbm [thread:$0]  (%p1281_p10), %s1454_s11, 4096, %s1452_s7, %s662_s15, %s1163_s9, %s1163_s9, %s1164_s10  }
 0x1ff PF: > { %s692_s18 = sand.u32 1, %s1134_s12   ;;  %p1530_p12 = scmp.ne.s32.totalorder %s1520_s23, 0 }
 0x200   : > { %p1531_p11 = scmp.ge.s32.totalorder %s1154_s17, 2  ;;  %s693_s26 = scalar_lea.sflag [#allocation4], %s692_s18 }
 0x202   : > { %p947_p0 = pnand %p1531_p11, %p1530_p12 }
 0x204   : > { %1129 = dma.done.wait (!%p947_p0), %s693_s26, 4096  }
 0x205   : > { %1131 = vsyncadd (!%p947_p0), %s693_s26, 4294963200  ;;  %s20_s17 = sadd.s32 1, %s1154_s17   ;;  %s1532_s12 = smov %s1138_s13 }
 0x206   : > { %p17_p5 = scmp.ge.s32.totalorder %s20_s17, 4   ;;  %s1533_s13 = smov %s1142_s14 }
 0x207   : > { %s1534_s14 = smov %s1290_s5  ;;  %s1535_s15 = smov %s1150_s16 }
 0x208   : > { %s1536_s16 = smov %s1538_s28  ;;  %19 = sbr.rel (!%p17_p5) target bundleno = 7 (0x7), region = 81 }
 0x20f   :  { %698 = vsyncpa [#allocation3], 1 }
 0x210   :  { %700 = vsyncpa [#allocation3 + $0x1], 1 }
 0x211   :  { %701 = vsyncpa [#allocation6], 1 }
 0x212   :  { %702 = vsyncpa [#allocation4], 1 }
 0x213   :  { %704 = vsyncpa [#allocation4 + $0x1], 1 }

// kernel: tpu_custom_call.1
= control target key start
LH: loop header
LB: loop body
LE: loop exit
PB: predicated region body
PF: predicated region fallthrough
CT: control target
= control target key end

     0   :  { %8 = vsyncpa [#allocation3], 0  ;;  %s1509_s0 = inlined_call_operand.hbm [shape: f32[2,32,256], index: 0, kind: input, shape index: {}]   ;;  %s1510_s1 = inlined_call_operand.hbm [shape: f32[32,128], index: 1, kind: input, shape index: {}]   ;;  %s1511_s2 = inlined_call_operand.vmem [shape: f32[1,128], index: 2, kind: input, shape index: {}]   ;;  %s1512_s3 = inlined_call_operand.hbm [shape: f32[2,256,128], index: 3, kind: output, shape index: {}]  }
   0x1   :  { %10 = vsyncpa [#allocation3 + $0x1], 0 }
   0x2   :  { %11 = vsyncpa [#allocation6], 0 }
   0x3   :  { %12 = vsyncpa [#allocation4], 0 }
   0x4   :  { %14 = vsyncpa [#allocation4 + $0x1], 0  ;;  %s1185_s12 = smov 0   ;;  %s1187_s13 = smov 0  }
   0x5   :  { %s1189_s14 = smov 0   ;;  %s1191_s15 = smov 0  }
   0x6   :  { %s1193_s16 = smov 0   ;;  %s1195_s17 = smov 0  }
   0x7 LB: > { %s774_s18 = sadd.s32 4294967295, %s1154_s17   ;;  %s775_s19 = sadd.s32 4294967294, %s1154_s17   ;;  %s1154_s17 = sphi %s1195_s17, %s20_s17   ;;  %s1150_s16 = sphi %s1193_s16, %s1536_s16   ;;  %s1146_s15 = sphi %s1191_s15, %s1535_s15   ;;  %s1142_s14 = sphi %s1189_s14, %s1534_s14   ;;  %s1138_s13 = sphi %s1187_s13, %s1533_s13   ;;  %s1134_s12 = sphi %s1185_s12, %s1532_s12  }
   0x8   : > { %p54_p0 = scmp.ne.s32.totalorder %s1138_s13, %s1134_s12  ;;  %p1219_p1 = scmp.eq.s32.totalorder %s774_s18, 0 }
   0x9   : > { %p1223_p2 = scmp.eq.s32.totalorder %s774_s18, 1  ;;  %p128_p3 = scmp.eq.s32.totalorder %s775_s19, 1 }
   0xa   : > { %s1517_s20 = scalar_select %p1219_p1, 1, 0 }
   0xb   : > { %s1518_s21 = scalar_select %p1223_p2, 1, 0 }
   0xc   : > { %p1229_p4 = por %p1219_p1, %p54_p0  ;;  %p776_p5 = scmp.ge.s32.totalorder %s1154_s17, 1 }
   0xd   : > { %p1234_p6 = por %p128_p3, %p54_p0  ;;  %p135_p7 = scmp.lt.s32.totalorder %s1154_s17, 3 }
   0xe   : > { %s1519_s22 = scalar_select %p1229_p4, 1, 0 }
   0xf   : > { %s1520_s23 = scalar_select %p1234_p6, 1, 0 }
  0x10   : > { %p1239_p8 = pnand %p776_p5, %p135_p7  ;;  %s1156_s25 = smov [#allocation5]  }
  0x11   : > { %s147_s26 = sshll.u32 %s1156_s25, 4  ;;  %s32_s28 = sadd.s32 1, %s1150_s16  ;;  %s148_s26 = int_to_ptr.vmem [resolvable:$true] %s147_s26 }
  0x12   : > { %s1521_s24 = scalar_select %p1239_p8, 1, 0 }
  0x13   : > { %p938_p9 = pneg %p1239_p8  ;;  %s1010_s4 = scalar_lea.hbm %s1510_s1, 512 }
  0x14   : > { %p1011_p12 = scmp.ne.s32.totalorder %s1510_s1, %s1010_s4  ;;  %p1017_p5 = scmp.lt.u32.totalorder %s1010_s4, %s1510_s1 }
  0x15   : > { %p1248_p11 = pnand %p938_p9, %p1219_p1 }
  0x17   : > { %p1012_p13 = pneg %p1248_p11 }
  0x19   : > { %p1013_p0 = pnand %p1012_p13, %p1011_p12 }
  0x1b   : > { %p1014_p3 = pneg %p1013_p0 }
  0x1d   : > { %p1019_p7 = pnand %p1017_p5, %p1014_p3 }
  0x1f   : > { %1022 = shalt.err (!%p1019_p7)
}
  0x20   : > { %s1023_s9 = scalar_lea.vmem %s148_s26, 512  ;;  %p1031_p1 = scmp.lt.s32.totalorder %s148_s26, %s148_s26 }
  0x21   : > { %p1024_p9 = scmp.ne.s32.totalorder %s148_s26, %s1023_s9  ;;  %p1032_p4 = scmp.lt.s32.totalorder %s1023_s9, %s1023_s9 }
  0x23   : > { %p1026_p10 = pnand %p1024_p9, %p1012_p13  ;;  %p1033_p8 = por %p1032_p4, %p1031_p1 }
  0x25   : > { %p1027_p6 = pneg %p1026_p10 }
  0x27   : > { %p1034_p2 = pnand %p1033_p8, %p1027_p6 }
  0x29   : > { %1037 = shalt.err (!%p1034_p2)
}
  0x2a   : > { %s1157_s10 = smov 128   ;;  %s1158_s11 = smov 8  }
  0x2b   : > { %941 = dma.hbm_to_vmem [thread:$0]  (!%p1248_p11), %s1510_s1, 512, %s148_s26, [#allocation6], %s1157_s10, %s1157_s10, %s1158_s11  }
  0x2c   : > { %p34_p1 = scmp.ge.s32.totalorder %s32_s28, 2  ;;  %s41_s25 = sadd.s32 1, %s1142_s14 }
  0x2d   : > { %p48_p2 = scmp.ne.s32.totalorder %s1142_s14, %s1138_s13  ;;  %p49_p4 = scmp.eq.s32.totalorder %s1154_s17, 0 }
  0x2e   : > { %s1538_s28 = smov (%p34_p1, %s32_s28), 0  ;;  %p1524_p8 = scmp.ne.s32.totalorder %s1518_s21, 0 }
  0x2f   : > { %p1275_p6 = por %p49_p4, %p48_p2  ;;  %s36_s27 = ssub.s32 %s1150_s16, %s1538_s28 }
  0x30   : > { %p1281_p10 = por %p1524_p8, %p48_p2  ;;  %p951_p12 = scmp.lt.s32.totalorder %s1154_s17, 2 }
  0x31   : > { %p39_p11 = scmp.eq.s32.totalorder %s36_s27, 0  ;;  %s164_s26 = sand.u32 1, %s1142_s14  }
  0x32   : > { %s779_s4 = sshll.u32 %s164_s26, 6  ;;  %s824_s6 = sshll.u32 %s1150_s16, 10 }
  0x33   : > { %s1290_s5 = scalar_select %p39_p11, %s1142_s14, %s41_s25  }
  0x34   : > { %s1296_s9 = scalar_lea.hbm %s1509_s0, %s824_s6  ;;  %s168_s21 = scalar_lea.vmem [#allocation2], %s779_s4 }
  0x35   : > { %s177_s10 = sshll.u32 %s168_s21, 4  ;;  %p1302_p13 = pnand %p951_p12, %p1275_p6  ;;  %s1298_s10 = int_to_ptr.vmem [resolvable:$true] %s177_s10 }
  0x36   : > { %s1306_s18 = scalar_lea.sflag [#allocation3], %s164_s26  ;;  %s1038_s19 = scalar_lea.hbm %s1296_s9, 1024 }
  0x37   : > { %p1039_p0 = scmp.ne.s32.totalorder %s1296_s9, %s1038_s19  ;;  %p1040_p3 = pneg %p1302_p13 }
  0x38   : > { %s1043_s29 = scalar_lea.hbm %s1509_s0, 2048  ;;  %p1044_p9 = scmp.lt.u32.totalorder %s1296_s9, %s1509_s0 }
  0x39   : > { %p1041_p5 = pnand %p1040_p3, %p1039_p0  ;;  %p1045_p1 = scmp.lt.u32.totalorder %s1043_s29, %s1038_s19 }
  0x3a   : > { %p1047_p4 = scmp.lt.u32.totalorder %s1038_s19, %s1296_s9 }
  0x3b   : > { %p1042_p7 = pneg %p1041_p5  ;;  %p1046_p2 = por %p1045_p1, %p1044_p9 }
  0x3d   : > { %p1048_p6 = por %p1047_p4, %p1046_p2 }
  0x3f   : > { %p1049_p8 = pnand %p1048_p6, %p1042_p7 }
  0x41   : > { %1052 = shalt.err (!%p1049_p8)
}
  0x42   : > { %s1053_s26 = scalar_lea.vmem %s1298_s10, 1024  ;;  %s1159_s7 = smov [#allocation2]  }
  0x43   : > { %p1054_p12 = scmp.ne.s32.totalorder %s1298_s10, %s1053_s26  ;;  %s1058_s8 = sshll.u32 %s1159_s7, 4  ;;  %s1059_s8 = int_to_ptr.vmem [resolvable:$false] %s1058_s8 }
  0x44   : > { %s1060_s21 = scalar_lea.vmem %s1059_s8, 2048  ;;  %p1061_p5 = scmp.lt.s32.totalorder %s1298_s10, %s1059_s8 }
  0x45   : > { %p1056_p11 = pnand %p1054_p12, %p1040_p3  ;;  %p1062_p9 = scmp.lt.s32.totalorder %s1060_s21, %s1053_s26 }
  0x47   : > { %p1057_p0 = pneg %p1056_p11  ;;  %p1063_p1 = por %p1062_p9, %p1061_p5 }
  0x49   : > { %p1064_p2 = pnand %p1063_p1, %p1057_p0 }
  0x4b   : > { %1067 = shalt.err (!%p1064_p2)
}
  0x4c   : > { %s1160_s19 = smov 256   ;;  %s1161_s25 = smov 16  }
  0x4d   : > { %945 = dma.hbm_to_vmem [thread:$0]  (!%p1302_p13), %s1296_s9, 1024, %s1298_s10, %s1306_s18, %s1160_s19, %s1160_s19, %s1161_s25  }
  0x4e   : > { %p1527_p3 = scmp.ne.s32.totalorder %s1521_s24, 0 }
  0x4f   : > { %s1337_s27 = sand.u32 (!%p1527_p3), 1, %s1138_s13   ;;  %p1528_p7 = scmp.ne.s32.totalorder (!%p1527_p3), %s1519_s22, 0 }
  0x50   : > { %189 = sbr.rel (%p1527_p3) target bundleno = 511 (0x1ff), region = 32  ;;  %s783_s29 = sshll.u32 (!%p1527_p3), %s1337_s27, 6 }
  0x51   : > { %s192_s4 = scalar_lea.sflag (!%p1527_p3), [#allocation3], %s1337_s27  ;;  %s195_s6 = scalar_lea.vmem (!%p1527_p3), [#allocation2], %s783_s29 }
  0x57   : > { %1121 = dma.done.wait (%p1528_p7), %s192_s4, 1024  }
  0x58   : > { %1123 = vsyncadd (%p1528_p7), %s192_s4, 4294966272  ;;  %p1529_p4 = scmp.ne.s32.totalorder %s1517_s20, 0 }
  0x5a   : > { %1125 = dma.done.wait (%p1529_p4), [#allocation6], 512  }
  0x5b   : > { %1127 = vsyncadd (%p1529_p4), [#allocation6], 4294966784  ;;  %v225_v0 = vld [vmem:[%s195_s6 + $0x8] sm:$0xff]  ;;  %v224_v1 = vld [vmem:[%s195_s6] sm:$0xff]  ;;  %vm307_vm0 = vcmask 261120   ;;  %s785_s20 = sshll.u32 %s1337_s27, 8 }
  0x5c   : > { %275 = vxpose.xlu1.b32.start [1/4] (short) %v225_v0, 128  ;;  %243 = vxpose.xlu0.b32.start [1/4] (short) %v224_v1, 128  ;;  %v227_v2 = vld [vmem:[%s195_s6 + $0x18] sm:$0xff]  ;;  %v226_v3 = vld [vmem:[%s195_s6 + $0x10] sm:$0xff]  ;;  %v232_v4 = vld [vmem:[#allocation5] sm:$0xff]  ;;  %s1391_s9 = scalar_lea.vmem [#allocation7], %s785_s20  ;;  %s825_s10 = sshll.u32 %s1146_s15, 12 }
  0x5d   : > { %v233_v5 = vld [vmem:[#allocation5 + $0x8] sm:$0xff]  ;;  %v234_v6 = vld [vmem:[#allocation5 + $0x10] sm:$0xff]  ;;  %v235_v7 = vld [vmem:[#allocation5 + $0x18] sm:$0xff]  ;;  %s677_s11 = sshll.u32 %s1391_s9, 4  ;;  %s1452_s7 = scalar_lea.hbm %s1512_s3, %s825_s10  ;;  %s1454_s11 = int_to_ptr.vmem [resolvable:$true] %s677_s11 }
  0x5e   : > { %v918_v8 = vpack.c.bf16 %v233_v5, %v232_v4  ;;  %v922_v9 = vpack.c.bf16 %v235_v7, %v234_v6  ;;  %v229_v10 = vld [vmem:[%s195_s6 + $0x28] sm:$0xff]  ;;  %v228_v11 = vld [vmem:[%s195_s6 + $0x20] sm:$0xff]  ;;  %v231_v12 = vld [vmem:[%s195_s6 + $0x38] sm:$0xff]  ;;  %s662_s15 = scalar_lea.sflag [#allocation4], %s1337_s27  ;;  %s1068_s8 = scalar_lea.vmem %s1454_s11, 4096 }
  0x5f   : > { %v230_v13 = vld [vmem:[%s195_s6 + $0x30] sm:$0xff]  ;;  %v1385_v46 = vld [vmem:[%s1511_s2] ss:$0 sm:$0xff]  ;;  %p1069_p13 = scmp.ne.s32.totalorder %s1454_s11, %s1068_s8  ;;  %s1162_s21 = smov [#allocation7]  }
  0x60   : > { %276 = vxpose.xlu1.b32.cont [2/4] (short) %v227_v2, 128  ;;  %244 = vxpose.xlu0.b32.cont [2/4] (short) %v226_v3, 128  ;;  %s1072_s19 = sshll.u32 %s1162_s21, 4  ;;  %s1073_s19 = int_to_ptr.vmem [resolvable:$false] %s1072_s19 }
  0x61   : > { %919 = vmatprep.subr.bf16.mxu0 %v918_v8  ;;  %926 = vmatprep.subr.bf16.mxu1 %v918_v8  ;;  %p1070_p6 = pnand %p1069_p13, %p1281_p10  ;;  %s1074_s25 = scalar_lea.vmem %s1073_s19, 8192 }
  0x62   : > { %921 = vmatpush3.bf16.msra.mxu0 %v918_v8  ;;  %928 = vmatpush3.bf16.msra.mxu1 %v918_v8  ;;  %p1075_p12 = scmp.lt.s32.totalorder %s1454_s11, %s1073_s19  ;;  %p1076_p11 = scmp.lt.s32.totalorder %s1074_s25, %s1068_s8 }
  0x63   : > { %923 = vmatprep.subr.bf16.mxu0 %v922_v9  ;;  %927 = vmatprep.subr.bf16.mxu1 %v922_v9  ;;  %p1071_p8 = pneg %p1070_p6 }
  0x64   : > { %277 = vxpose.xlu1.b32.cont [3/4] (short) %v229_v10, 128  ;;  %245 = vxpose.xlu0.b32.cont [3/4] (short) %v228_v11, 128  ;;  %p1077_p0 = por %p1076_p11, %p1075_p12 }
  0x66   : > { %925 = vmatpush3.bf16.msra.mxu0 %v922_v9  ;;  %929 = vmatpush3.bf16.msra.mxu1 %v922_v9  ;;  %p1078_p5 = pnand %p1077_p0, %p1071_p8 }
  0x68   : > { %278 = vxpose.xlu1.b32.end [4/4] (short) %v231_v12, 128  ;;  %246 = vxpose.xlu0.b32.end [4/4] (short) %v230_v13, 128 }
  0xdc   : > { %v291_v14 = vpop.trf.xlu1  ;;  %v259_v15 = vpop.trf.xlu0 }
  0xdd   : > { %870 = vmatprep.mubr.msk.f32.mxu0 %vm307_vm0, %v259_v15  ;;  %894 = vmatprep.mubr.msk.f32.mxu1 %vm307_vm0, %v291_v14 }
  0xe0   : > { %v292_v16 = vpop.trf.xlu1  ;;  %v260_v17 = vpop.trf.xlu0 }
  0xe1   : > { %871 = vmatmul.mubr.msk.f32.vlgmr.msra.gmra.mrb[0].mxu0 %vm307_vm0, %v260_v17  ;;  %895 = vmatmul.mubr.msk.f32.vlgmr.msra.gmra.mrb[0].mxu1 %vm307_vm0, %v292_v16 }
  0xe4   : > { %v293_v18 = vpop.trf.xlu1  ;;  %v261_v19 = vpop.trf.xlu0 }
  0xe5   : > { %873 = vmatprep.mubr.msk.f32.mxu0 %vm307_vm0, %v261_v19  ;;  %897 = vmatprep.mubr.msk.f32.mxu1 %vm307_vm0, %v293_v18 }
  0xe8   : > { %v294_v20 = vpop.trf.xlu1  ;;  %v262_v21 = vpop.trf.xlu0 }
  0xe9   : > { %874 = vmatmul.mubr.msk.f32.gmra.mrb[2].mxu0 %vm307_vm0, %v262_v21  ;;  %898 = vmatmul.mubr.msk.f32.gmra.mrb[2].mxu1 %vm307_vm0, %v294_v20 }
  0xec   : > { %v295_v22 = vpop.trf.xlu1  ;;  %v263_v23 = vpop.trf.xlu0 }
  0xed   : > { %876 = vmatprep.mubr.msk.f32.mxu0 %vm307_vm0, %v263_v23  ;;  %900 = vmatprep.mubr.msk.f32.mxu1 %vm307_vm0, %v295_v22 }
  0xf0   : > { %v296_v24 = vpop.trf.xlu1  ;;  %v264_v25 = vpop.trf.xlu0 }
  0xf1   : > { %877 = vmatmul.mubr.msk.f32.gmra.mrb[4].mxu0 %vm307_vm0, %v264_v25  ;;  %901 = vmatmul.mubr.msk.f32.gmra.mrb[4].mxu1 %vm307_vm0, %v296_v24 }
  0xf4   : > { %v297_v26 = vpop.trf.xlu1  ;;  %v265_v27 = vpop.trf.xlu0 }
  0xf5   : > { %879 = vmatprep.mubr.msk.f32.mxu0 %vm307_vm0, %v265_v27  ;;  %903 = vmatprep.mubr.msk.f32.mxu1 %vm307_vm0, %v297_v26 }
  0xf8   : > { %v298_v28 = vpop.trf.xlu1  ;;  %v266_v29 = vpop.trf.xlu0 }
  0xf9   : > { %880 = vmatmul.mubr.msk.f32.gmra.mrb[6].mxu0 %vm307_vm0, %v266_v29  ;;  %904 = vmatmul.mubr.msk.f32.gmra.mrb[6].mxu1 %vm307_vm0, %v298_v28 }
  0xfc   : > { %v299_v30 = vpop.trf.xlu1  ;;  %v267_v31 = vpop.trf.xlu0 }
  0xfd   : > { %882 = vmatprep.mubr.msk.f32.mxu0 %vm307_vm0, %v267_v31  ;;  %906 = vmatprep.mubr.msk.f32.mxu1 %vm307_vm0, %v299_v30 }
 0x100   : > { %v300_v32 = vpop.trf.xlu1  ;;  %v268_v33 = vpop.trf.xlu0 }
 0x101   : > { %883 = vmatmul.mubr.msk.f32.gmra.mrb[8].mxu0 %vm307_vm0, %v268_v33  ;;  %907 = vmatmul.mubr.msk.f32.gmra.mrb[8].mxu1 %vm307_vm0, %v300_v32 }
 0x104   : > { %v301_v34 = vpop.trf.xlu1  ;;  %v269_v35 = vpop.trf.xlu0 }
 0x105   : > { %885 = vmatprep.mubr.msk.f32.mxu0 %vm307_vm0, %v269_v35  ;;  %909 = vmatprep.mubr.msk.f32.mxu1 %vm307_vm0, %v301_v34 }
 0x108   : > { %v302_v36 = vpop.trf.xlu1  ;;  %v270_v37 = vpop.trf.xlu0 }
 0x109   : > { %886 = vmatmul.mubr.msk.f32.gmra.mrb[10].mxu0 %vm307_vm0, %v270_v37  ;;  %910 = vmatmul.mubr.msk.f32.gmra.mrb[10].mxu1 %vm307_vm0, %v302_v36 }
 0x10c   : > { %v303_v38 = vpop.trf.xlu1  ;;  %v271_v39 = vpop.trf.xlu0 }
 0x10d   : > { %888 = vmatprep.mubr.msk.f32.mxu0 %vm307_vm0, %v271_v39  ;;  %912 = vmatprep.mubr.msk.f32.mxu1 %vm307_vm0, %v303_v38 }
 0x110   : > { %v304_v40 = vpop.trf.xlu1  ;;  %v272_v41 = vpop.trf.xlu0 }
 0x111   : > { %889 = vmatmul.mubr.msk.f32.gmra.mrb[12].mxu0 %vm307_vm0, %v272_v41  ;;  %913 = vmatmul.mubr.msk.f32.gmra.mrb[12].mxu1 %vm307_vm0, %v304_v40 }
 0x114   : > { %v305_v42 = vpop.trf.xlu1  ;;  %v273_v43 = vpop.trf.xlu0 }
 0x115   : > { %891 = vmatprep.mubr.msk.f32.mxu0 %vm307_vm0, %v273_v43  ;;  %915 = vmatprep.mubr.msk.f32.mxu1 %vm307_vm0, %v305_v42 }
 0x118   : > { %v306_v44 = vpop.trf.xlu1  ;;  %v274_v45 = vpop.trf.xlu0 }
 0x119   : > { %892 = vmatmul.mubr.msk.f32.gmra.mrb[14].mxu0 %vm307_vm0, %v274_v45  ;;  %916 = vmatmul.mubr.msk.f32.gmra.mrb[14].mxu1 %vm307_vm0, %v306_v44 }
 0x1b4   : > { %v872_v47 = vpop.f32.mrb[0].mxu0  ;;  %v896_v48 = vpop.f32.mrb[0].mxu1 }
 0x1b5   : > { %v476_v49 = vadd.f32 %v872_v47, %v1385_v46  ;;  %v556_v50 = vadd.f32 %v896_v48, %v1385_v46  ;;  %v470_v51 = vpop.f32.mrb[1].mxu0  ;;  %v550_v52 = vpop.f32.mrb[1].mxu1 }
 0x1b6   : > { %v471_v53 = vadd.f32 %v1385_v46, %v470_v51  ;;  %v551_v54 = vadd.f32 %v1385_v46, %v550_v52 }
 0x1b7   : > { %630 = vst [vmem:[%s1391_s9 + $0x8] sm:$0xff] %v476_v49  ;;  %646 = vst [vmem:[%s1391_s9 + $0x88] sm:$0xff] %v556_v50 }
 0x1b8   : > { %629 = vst [vmem:[%s1391_s9] sm:$0xff] %v471_v53  ;;  %645 = vst [vmem:[%s1391_s9 + $0x80] sm:$0xff] %v551_v54 }
 0x1bc   : > { %v875_v55 = vpop.f32.mrb[2].mxu0  ;;  %v899_v56 = vpop.f32.mrb[2].mxu1 }
 0x1bd   : > { %v486_v57 = vadd.f32 %v875_v55, %v1385_v46  ;;  %v566_v58 = vadd.f32 %v899_v56, %v1385_v46  ;;  %v480_v59 = vpop.f32.mrb[3].mxu0  ;;  %v560_v60 = vpop.f32.mrb[3].mxu1 }
 0x1be   : > { %v481_v61 = vadd.f32 %v1385_v46, %v480_v59  ;;  %v561_v62 = vadd.f32 %v1385_v46, %v560_v60 }
 0x1bf   : > { %632 = vst [vmem:[%s1391_s9 + $0x18] sm:$0xff] %v486_v57  ;;  %648 = vst [vmem:[%s1391_s9 + $0x98] sm:$0xff] %v566_v58 }
 0x1c0   : > { %631 = vst [vmem:[%s1391_s9 + $0x10] sm:$0xff] %v481_v61  ;;  %647 = vst [vmem:[%s1391_s9 + $0x90] sm:$0xff] %v561_v62 }
 0x1c4   : > { %v878_v63 = vpop.f32.mrb[4].mxu0  ;;  %v902_v0 = vpop.f32.mrb[4].mxu1 }
 0x1c5   : > { %v496_v1 = vadd.f32 %v878_v63, %v1385_v46  ;;  %v576_v2 = vadd.f32 %v902_v0, %v1385_v46  ;;  %v490_v3 = vpop.f32.mrb[5].mxu0  ;;  %v570_v4 = vpop.f32.mrb[5].mxu1 }
 0x1c6   : > { %v491_v5 = vadd.f32 %v1385_v46, %v490_v3  ;;  %v571_v6 = vadd.f32 %v1385_v46, %v570_v4 }
 0x1c7   : > { %634 = vst [vmem:[%s1391_s9 + $0x28] sm:$0xff] %v496_v1  ;;  %650 = vst [vmem:[%s1391_s9 + $0xa8] sm:$0xff] %v576_v2 }
 0x1c8   : > { %633 = vst [vmem:[%s1391_s9 + $0x20] sm:$0xff] %v491_v5  ;;  %649 = vst [vmem:[%s1391_s9 + $0xa0] sm:$0xff] %v571_v6 }
 0x1cc   : > { %v881_v7 = vpop.f32.mrb[6].mxu0  ;;  %v905_v8 = vpop.f32.mrb[6].mxu1 }
 0x1cd   : > { %v506_v9 = vadd.f32 %v881_v7, %v1385_v46  ;;  %v586_v10 = vadd.f32 %v905_v8, %v1385_v46  ;;  %v500_v11 = vpop.f32.mrb[7].mxu0  ;;  %v580_v12 = vpop.f32.mrb[7].mxu1 }
 0x1ce   : > { %v501_v13 = vadd.f32 %v1385_v46, %v500_v11  ;;  %v581_v14 = vadd.f32 %v1385_v46, %v580_v12 }
 0x1cf   : > { %636 = vst [vmem:[%s1391_s9 + $0x38] sm:$0xff] %v506_v9  ;;  %652 = vst [vmem:[%s1391_s9 + $0xb8] sm:$0xff] %v586_v10 }
 0x1d0   : > { %635 = vst [vmem:[%s1391_s9 + $0x30] sm:$0xff] %v501_v13  ;;  %651 = vst [vmem:[%s1391_s9 + $0xb0] sm:$0xff] %v581_v14 }
 0x1d4   : > { %v884_v15 = vpop.f32.mrb[8].mxu0  ;;  %v908_v16 = vpop.f32.mrb[8].mxu1 }
 0x1d5   : > { %v516_v17 = vadd.f32 %v884_v15, %v1385_v46  ;;  %v596_v18 = vadd.f32 %v908_v16, %v1385_v46  ;;  %v510_v19 = vpop.f32.mrb[9].mxu0  ;;  %v590_v20 = vpop.f32.mrb[9].mxu1 }
 0x1d6   : > { %v511_v21 = vadd.f32 %v1385_v46, %v510_v19  ;;  %v591_v22 = vadd.f32 %v1385_v46, %v590_v20 }
 0x1d7   : > { %638 = vst [vmem:[%s1391_s9 + $0x48] sm:$0xff] %v516_v17  ;;  %654 = vst [vmem:[%s1391_s9 + $0xc8] sm:$0xff] %v596_v18 }
 0x1d8   : > { %637 = vst [vmem:[%s1391_s9 + $0x40] sm:$0xff] %v511_v21  ;;  %653 = vst [vmem:[%s1391_s9 + $0xc0] sm:$0xff] %v591_v22 }
 0x1dc   : > { %v887_v23 = vpop.f32.mrb[10].mxu0  ;;  %v911_v24 = vpop.f32.mrb[10].mxu1 }
 0x1dd   : > { %v526_v25 = vadd.f32 %v887_v23, %v1385_v46  ;;  %v606_v26 = vadd.f32 %v911_v24, %v1385_v46  ;;  %v520_v27 = vpop.f32.mrb[11].mxu0  ;;  %v600_v28 = vpop.f32.mrb[11].mxu1 }
 0x1de   : > { %v521_v29 = vadd.f32 %v1385_v46, %v520_v27  ;;  %v601_v30 = vadd.f32 %v1385_v46, %v600_v28 }
 0x1df   : > { %640 = vst [vmem:[%s1391_s9 + $0x58] sm:$0xff] %v526_v25  ;;  %656 = vst [vmem:[%s1391_s9 + $0xd8] sm:$0xff] %v606_v26 }
 0x1e0   : > { %639 = vst [vmem:[%s1391_s9 + $0x50] sm:$0xff] %v521_v29  ;;  %655 = vst [vmem:[%s1391_s9 + $0xd0] sm:$0xff] %v601_v30 }
 0x1e4   : > { %v890_v31 = vpop.f32.mrb[12].mxu0  ;;  %v914_v32 = vpop.f32.mrb[12].mxu1 }
 0x1e5   : > { %v536_v33 = vadd.f32 %v890_v31, %v1385_v46  ;;  %v616_v34 = vadd.f32 %v914_v32, %v1385_v46  ;;  %v530_v35 = vpop.f32.mrb[13].mxu0  ;;  %v610_v36 = vpop.f32.mrb[13].mxu1 }
 0x1e6   : > { %v531_v37 = vadd.f32 %v1385_v46, %v530_v35  ;;  %v611_v38 = vadd.f32 %v1385_v46, %v610_v36 }
 0x1e7   : > { %642 = vst [vmem:[%s1391_s9 + $0x68] sm:$0xff] %v536_v33  ;;  %658 = vst [vmem:[%s1391_s9 + $0xe8] sm:$0xff] %v616_v34 }
 0x1e8   : > { %641 = vst [vmem:[%s1391_s9 + $0x60] sm:$0xff] %v531_v37  ;;  %657 = vst [vmem:[%s1391_s9 + $0xe0] sm:$0xff] %v611_v38 }
 0x1ec   : > { %v893_v39 = vpop.f32.mrb[14].mxu0  ;;  %v917_v40 = vpop.f32.mrb[14].mxu1 }
 0x1ed   : > { %v546_v41 = vadd.f32 %v893_v39, %v1385_v46  ;;  %v626_v42 = vadd.f32 %v917_v40, %v1385_v46  ;;  %v540_v43 = vpop.f32.mrb[15].mxu0  ;;  %v620_v44 = vpop.f32.mrb[15].mxu1 }
 0x1ee   : > { %v541_v45 = vadd.f32 %v1385_v46, %v540_v43  ;;  %v621_v47 = vadd.f32 %v1385_v46, %v620_v44 }
 0x1ef   : > { %644 = vst [vmem:[%s1391_s9 + $0x78] sm:$0xff] %v546_v41  ;;  %660 = vst [vmem:[%s1391_s9 + $0xf8] sm:$0xff] %v626_v42 }
 0x1f0   : > { %643 = vst [vmem:[%s1391_s9 + $0x70] sm:$0xff] %v541_v45  ;;  %659 = vst [vmem:[%s1391_s9 + $0xf0] sm:$0xff] %v621_v47 }
 0x1f1   : > { %1081 = shalt.err (!%p1078_p5)
}
 0x1f2   : > { %s1082_s29 = scalar_lea.hbm %s1452_s7, 4096  ;;  %s1086_s20 = scalar_lea.hbm %s1512_s3, 8192 }
 0x1f3   : > { %p1083_p9 = scmp.ne.s32.totalorder %s1452_s7, %s1082_s29  ;;  %p1087_p3 = scmp.lt.u32.totalorder %s1452_s7, %s1512_s3 }
 0x1f4   : > { %p1088_p7 = scmp.lt.u32.totalorder %s1086_s20, %s1082_s29  ;;  %p1090_p13 = scmp.lt.u32.totalorder %s1082_s29, %s1452_s7 }
 0x1f5   : > { %p1084_p1 = pnand %p1083_p9, %p1281_p10 }
 0x1f6   : > { %p1089_p4 = por %p1088_p7, %p1087_p3 }
 0x1f7   : > { %p1085_p2 = pneg %p1084_p1 }
 0x1f8   : > { %p1091_p6 = por %p1090_p13, %p1089_p4 }
 0x1fa   : > { %p1092_p8 = pnand %p1091_p6, %p1085_p2 }
 0x1fc   : > { %1095 = shalt.err (!%p1092_p8)
}
 0x1fd   : > { %s1163_s9 = smov 128   ;;  %s1164_s10 = smov 8  }
 0x1fe   : > { %936 = dma.vmem_to_hbm [thread:$0]  (%p1281_p10), %s1454_s11, 4096, %s1452_s7, %s662_s15, %s1163_s9, %s1163_s9, %s1164_s10  }
 0x1ff PF: > { %s692_s18 = sand.u32 1, %s1134_s12   ;;  %p1530_p12 = scmp.ne.s32.totalorder %s1520_s23, 0 }
 0x200   : > { %p1531_p11 = scmp.ge.s32.totalorder %s1154_s17, 2  ;;  %s693_s26 = scalar_lea.sflag [#allocation4], %s692_s18 }
 0x202   : > { %p947_p0 = pnand %p1531_p11, %p1530_p12 }
 0x204   : > { %1129 = dma.done.wait (!%p947_p0), %s693_s26, 4096  }
 0x205   : > { %1131 = vsyncadd (!%p947_p0), %s693_s26, 4294963200  ;;  %s20_s17 = sadd.s32 1, %s1154_s17   ;;  %s1532_s12 = smov %s1138_s13 }
 0x206   : > { %p17_p5 = scmp.ge.s32.totalorder %s20_s17, 4   ;;  %s1533_s13 = smov %s1142_s14 }
 0x207   : > { %s1534_s14 = smov %s1290_s5  ;;  %s1535_s15 = smov %s1150_s16 }
 0x208   : > { %s1536_s16 = smov %s1538_s28  ;;  %19 = sbr.rel (!%p17_p5) target bundleno = 7 (0x7), region = 81 }
 0x20f   :  { %698 = vsyncpa [#allocation3], 1 }
 0x210   :  { %700 = vsyncpa [#allocation3 + $0x1], 1 }
 0x211   :  { %701 = vsyncpa [#allocation6], 1 }
 0x212   :  { %702 = vsyncpa [#allocation4], 1 }
 0x213   :  { %704 = vsyncpa [#allocation4 + $0x1], 1 }

</bundles_post_ra>
